<compile_context>
chip_gen: v5e
topology: v5e:2x2
jax: 0.10.0
libtpu: 0.0.40
codegen_flags: <defaults>
</compile_context>

<pallas_src>
import jax
import jax.numpy as jnp
from jax.experimental import pallas as pl
from jax.experimental.pallas import tpu as pltpu

# --- "opt" hyperparameters (small, consistent with the module) ---------------
HIDDEN = 32                    # opt.hiddenSize == opt.in_dims[-1]
CHANNELS = 2                   # opt.channels[-1]
C_DIM = HIDDEN // CHANNELS     # opt.c_dims[-1]
D_OUT = CHANNELS * C_DIM       # concatenated disentangled width
ITERATIONS = 3                 # opt.iterations
BETA = 0.3                     # opt.beta
N_NODE = 40
SEQ = 8
BATCH = 2


# --- kernel helpers -----------------------------------------------------------
def _channel_l2norm(z):
    """L2-normalize each contiguous C_DIM chunk (= channel) of the last axis."""
    parts = []
    for k in range(CHANNELS):                         # CHANNELS is tiny, static unroll
        zk = z[..., k * C_DIM:(k + 1) * C_DIM]
        parts.append(zk * jax.lax.rsqrt(jnp.sum(zk * zk, axis=-1, keepdims=True) + 1e-12))
    return jnp.concatenate(parts, axis=-1)


# --- fused Pallas kernel ------------------------------------------------------
def fused_dagnn_kernel(h_ref, a_ref, w_ref, b_ref, hid_ref, cor_ref):
    """Fused rout_emb_cor + DAGNN propagation.

    h_ref: (bb, S, H) embedded items        a_ref: (bb, S, S) = A_in + A_out
    w_ref: (H, D_OUT) fused routing weight  b_ref: (1, D_OUT) fused routing bias
    hid_ref / cor_ref: (bb, S, D_OUT) outputs (DAGNN output / routed embedding)
    """
    h = h_ref[...]                                    # (bb, S, H)
    A = a_ref[...]                                    # (bb, S, S)
    W = w_ref[...]                                    # (H, D_OUT)
    bias = b_ref[...]                                 # (1, D_OUT)
    bb, S, H = h.shape
    D = W.shape[1]

    # Routing: one fused matmul over all channels on the flattened (bb*S, H) block,
    # single tanh push, per-channel L2 norm; stored as one full (bb, S, D) tile.
    hf = h.reshape(bb * S, H)
    zf = jnp.tanh(jnp.dot(hf, W, preferred_element_type=jnp.float32) + bias)
    z = _channel_l2norm(zf).reshape(bb, S, D)
    cor_ref[...] = z.astype(cor_ref.dtype)

    # Propagation: ITERATIONS of (A_in + A_out) @ Z on the concatenated channels.
    for _ in range(ITERATIONS):                       # small, fixed static unroll
        m = jnp.einsum("bij,bjc->bic", A, z, preferred_element_type=jnp.float32)
        z = _channel_l2norm(z + BETA * m)
    hid_ref[...] = z.astype(hid_ref.dtype)


# --- wrapper ------------------------------------------------------------------
def fused_dagnn(hidden, A_sum, W, bias, *, batch_block=None):
    B, S, H = hidden.shape
    D = W.shape[1]
    # Default: collapse the batch grid entirely (best on single-TC v5e/v6e).
    # On v7x, pass batch_block = B // 2 so the 2-step "parallel" grid feeds both TCs.
    bb = B if batch_block is None else batch_block
    assert B % bb == 0
    grid = (B // bb,)

    hid, cor = pl.pallas_call(
        fused_dagnn_kernel,
        out_shape=(
            jax.ShapeDtypeStruct((B, S, D), jnp.float32),
            jax.ShapeDtypeStruct((B, S, D), jnp.float32),
        ),
        grid_spec=pltpu.PrefetchScalarGridSpec(
            num_scalar_prefetch=0,
            grid=grid,
            in_specs=[
                pl.BlockSpec((bb, S, H), lambda i: (i, 0, 0)),
                pl.BlockSpec((bb, S, S), lambda i: (i, 0, 0)),
                # grid-invariant weights: full-array blocks, constant index map
                pl.BlockSpec((H, D), lambda i: (0, 0)),
                pl.BlockSpec((1, D), lambda i: (0, 0)),
            ],
            out_specs=[
                pl.BlockSpec((bb, S, D), lambda i: (i, 0, 0)),
                pl.BlockSpec((bb, S, D), lambda i: (i, 0, 0)),
            ],
        ),
        compiler_params=pltpu.CompilerParams(dimension_semantics=("parallel",)),
    )(hidden, A_sum, W, bias)
    return hid, cor


def session_graph_forward(params, inputs, A, *, batch_block=None):
    """Pallas implementation of SessionGraph.forward -> (hidden, cor_hidden)."""
    # Embedding lookup (data-dependent gather) kept as plain-JAX glue.
    hidden = jnp.take(params["embedding"], inputs, axis=0)            # (B, S, H)
    # Precompute A_in + A_out once in the wrapper (mathematically identical to
    # A_in @ z + A_out @ z inside the loop, halves in-kernel MXU work).
    A_sum = A[:, :, :SEQ] + A[:, :, SEQ:]                             # (B, S, S)
    # Fold per-channel routing weights into one (H, CHANNELS*C_DIM) matrix/bias
    # so channel chunks land contiguously in the output layout.
    W = params["w_route"].transpose(1, 0, 2).reshape(HIDDEN, D_OUT)   # (H, D_OUT)
    bias = params["b_route"].reshape(1, D_OUT)                        # (1, D_OUT)
    hidden_out, cor_hidden = fused_dagnn(hidden, A_sum, W, bias, batch_block=batch_block)
    return hidden_out, cor_hidden


# --- pure-JAX reference for validation -----------------------------------------
def ref_forward(params, inputs, A):
    hidden = params["embedding"][inputs]
    zs = []
    for k in range(CHANNELS):
        z = jnp.tanh(jnp.einsum("bsh,hc->bsc", hidden, params["w_route"][k])
                     + params["b_route"][k][None, None, :])
        zs.append(z * jax.lax.rsqrt(jnp.sum(z * z, -1, keepdims=True) + 1e-12))
    cor = jnp.concatenate(zs, -1)
    A_in, A_out = A[:, :, :SEQ], A[:, :, SEQ:]
    outs = []
    for z in zs:
        for _ in range(ITERATIONS):
            m = jnp.einsum("bij,bjc->bic", A_in, z) + jnp.einsum("bij,bjc->bic", A_out, z)
            z = z + BETA * m
            z = z * jax.lax.rsqrt(jnp.sum(z * z, -1, keepdims=True) + 1e-12)
        outs.append(z)
    return jnp.concatenate(outs, -1), cor


# --- parameter init (reset_parameters: uniform(-stdv, stdv), stdv = 1/sqrt(H)) --
def init_params(key):
    stdv = 1.0 / (HIDDEN ** 0.5)
    k_emb, k_w, k_b = jax.random.split(key, 3)
    return {
        "embedding": jax.random.uniform(k_emb, (N_NODE, HIDDEN), jnp.float32, -stdv, stdv),
        "w_route": jax.random.uniform(k_w, (CHANNELS, HIDDEN, C_DIM), jnp.float32, -stdv, stdv),
        "b_route": jax.random.uniform(k_b, (CHANNELS, C_DIM), jnp.float32, -stdv, stdv),
    }


if __name__ == "__main__":
    key = jax.random.PRNGKey(0)
    k_p, k_in, k_a = jax.random.split(key, 3)

    params = init_params(k_p)
    inputs = jax.random.randint(k_in, (BATCH, SEQ), 1, N_NODE, dtype=jnp.int32)

    # SR-GNN style normalized in/out adjacency: [B, S, 2S]
    raw = jax.random.uniform(k_a, (BATCH, SEQ, 2 * SEQ), jnp.float32, 0.0, 1.0)
    raw_in = raw[:, :, :SEQ] / jnp.sum(raw[:, :, :SEQ], axis=-1, keepdims=True)
    raw_out = raw[:, :, SEQ:] / jnp.sum(raw[:, :, SEQ:], axis=-1, keepdims=True)
    A = jnp.concatenate([raw_in, raw_out], axis=-1)

    hidden_out, cor_hidden = jax.jit(session_graph_forward)(params, inputs, A)
    hidden_out = jax.block_until_ready(hidden_out)
    cor_hidden = jax.block_until_ready(cor_hidden)

    ref_hidden, ref_cor = ref_forward(params, inputs, A)

    assert hidden_out.shape == (BATCH, SEQ, D_OUT)
    assert cor_hidden.shape == (BATCH, SEQ, D_OUT)
    assert bool(jnp.all(jnp.isfinite(hidden_out))) and bool(jnp.all(jnp.isfinite(cor_hidden)))
    assert jnp.allclose(hidden_out, ref_hidden, rtol=1e-2, atol=1e-2)
    assert jnp.allclose(cor_hidden, ref_cor, rtol=1e-2, atol=1e-2)

    print("KERNEL_OK")
</pallas_src>

<mosaic_0001>
module attributes {stable_mosaic.version = 11 : i64} {
  func.func @fused_dagnn_kernel(%arg0: i32, %arg1: memref<2x8x32xf32, #tpu.memory_space<vmem>>, %arg2: memref<2x8x8xf32, #tpu.memory_space<vmem>>, %arg3: memref<32x32xf32, #tpu.memory_space<vmem>>, %arg4: memref<1x32xf32, #tpu.memory_space<vmem>>, %arg5: memref<2x8x32xf32, #tpu.memory_space<vmem>>, %arg6: memref<2x8x32xf32, #tpu.memory_space<vmem>>) attributes {dimension_semantics = [#tpu.dimension_semantics<parallel>], iteration_bounds = array<i64: 1>, scalar_prefetch = 0 : i64, scratch_operands = 0 : i64, tpu.core_type = #tpu.core_type<tc>, window_params = [{transform_indices = @transform_0, window_bounds = array<i64: 2, 8, 32>}, {transform_indices = @transform_1, window_bounds = array<i64: 2, 8, 8>}, {pipeline_mode = #tpu.pipeline_mode<synchronous>, transform_indices = @transform_2, window_bounds = array<i64: 32, 32>}, {pipeline_mode = #tpu.pipeline_mode<synchronous>, transform_indices = @transform_3, window_bounds = array<i64: 1, 32>}, {transform_indices = @transform_4, window_bounds = array<i64: 2, 8, 32>}, {transform_indices = @transform_5, window_bounds = array<i64: 2, 8, 32>}]} {
    %c0 = arith.constant 0 : index
    %c0_0 = arith.constant 0 : index
    %c0_1 = arith.constant 0 : index
    %0 = vector.load %arg1[%c0, %c0_0, %c0_1] : memref<2x8x32xf32, #tpu.memory_space<vmem>>, vector<2x8x32xf32>
    %c0_2 = arith.constant 0 : index
    %c0_3 = arith.constant 0 : index
    %c0_4 = arith.constant 0 : index
    %1 = vector.load %arg2[%c0_2, %c0_3, %c0_4] : memref<2x8x8xf32, #tpu.memory_space<vmem>>, vector<2x8x8xf32>
    %c0_5 = arith.constant 0 : index
    %c0_6 = arith.constant 0 : index
    %2 = vector.load %arg3[%c0_5, %c0_6] : memref<32x32xf32, #tpu.memory_space<vmem>>, vector<32x32xf32>
    %c0_7 = arith.constant 0 : index
    %c0_8 = arith.constant 0 : index
    %3 = vector.load %arg4[%c0_7, %c0_8] : memref<1x32xf32, #tpu.memory_space<vmem>>, vector<1x32xf32>
    %4 = vector.shape_cast %0 : vector<2x8x32xf32> to vector<16x32xf32>
    %cst = arith.constant dense<0.000000e+00> : vector<16x32xf32>
    %5 = tpu.matmul %4, %2, %cst {dimension_numbers = #tpu.dot_dimension_numbers<[1], [0], [0], [1], [0, 0, 1, 1], [], []>} : vector<16x32xf32>, vector<32x32xf32>, vector<16x32xf32> -> vector<16x32xf32>
    %6 = vector.broadcast %3 : vector<1x32xf32> to vector<16x32xf32>
    %7 = arith.addf %5, %6 : vector<16x32xf32>
    %8 = math.tanh %7 : vector<16x32xf32>
    %9 = vector.extract_strided_slice %8 {offsets = [0, 0], sizes = [16, 16], strides = [1, 1]} : vector<16x32xf32> to vector<16x16xf32>
    %10 = arith.mulf %9, %9 : vector<16x16xf32>
    %cst_9 = arith.constant dense<0.000000e+00> : vector<16xf32>
    %11 = vector.multi_reduction <add>, %10, %cst_9 [1] : vector<16x16xf32> to vector<16xf32>
    %12 = vector.shape_cast %11 : vector<16xf32> to vector<16x1xf32>
    %cst_10 = arith.constant 9.99999996E-13 : f32
    %13 = vector.broadcast %cst_10 : f32 to vector<16x1xf32>
    %14 = arith.addf %12, %13 : vector<16x1xf32>
    %15 = math.rsqrt %14 : vector<16x1xf32>
    %16 = vector.broadcast %15 : vector<16x1xf32> to vector<16x16xf32>
    %17 = arith.mulf %9, %16 : vector<16x16xf32>
    %18 = vector.extract_strided_slice %8 {offsets = [0, 16], sizes = [16, 16], strides = [1, 1]} : vector<16x32xf32> to vector<16x16xf32>
    %19 = arith.mulf %18, %18 : vector<16x16xf32>
    %cst_11 = arith.constant dense<0.000000e+00> : vector<16xf32>
    %20 = vector.multi_reduction <add>, %19, %cst_11 [1] : vector<16x16xf32> to vector<16xf32>
    %21 = vector.shape_cast %20 : vector<16xf32> to vector<16x1xf32>
    %cst_12 = arith.constant 9.99999996E-13 : f32
    %22 = vector.broadcast %cst_12 : f32 to vector<16x1xf32>
    %23 = arith.addf %21, %22 : vector<16x1xf32>
    %24 = math.rsqrt %23 : vector<16x1xf32>
    %25 = vector.broadcast %24 : vector<16x1xf32> to vector<16x16xf32>
    %26 = arith.mulf %18, %25 : vector<16x16xf32>
    %27 = tpu.concatenate %17, %26 in 1 : vector<16x16xf32>, vector<16x16xf32> -> vector<16x32xf32>
    %28 = vector.shape_cast %27 : vector<16x32xf32> to vector<2x8x32xf32>
    %c0_13 = arith.constant 0 : index
    %c0_14 = arith.constant 0 : index
    %c0_15 = arith.constant 0 : index
    %29 = vector.load %arg6[%c0_13, %c0_14, %c0_15] : memref<2x8x32xf32, #tpu.memory_space<vmem>>, vector<2x8x32xf32>
    tpu.vector_store %arg6[%c0_13, %c0_14, %c0_15], %28 {strides = array<i32>} : memref<2x8x32xf32, #tpu.memory_space<vmem>>, vector<2x8x32xf32>,
    "tpu.trace_start"() <{level = 10 : i32, message = "bij,bjc->bic"}> : () -> ()
    %cst_16 = arith.constant dense<0.000000e+00> : vector<2x8x32xf32>
    %30 = tpu.matmul %1, %28, %cst_16 {dimension_numbers = #tpu.dot_dimension_numbers<[2], [1], [1], [2], [0, 0, 0, 1, 1, 2], [0], [0]>} : vector<2x8x8xf32>, vector<2x8x32xf32>, vector<2x8x32xf32> -> vector<2x8x32xf32>
    "tpu.trace_stop"() : () -> ()
    %cst_17 = arith.constant 3.000000e-01 : f32
    %31 = vector.broadcast %cst_17 : f32 to vector<2x8x32xf32>
    %32 = arith.mulf %31, %30 : vector<2x8x32xf32>
    %33 = arith.addf %28, %32 : vector<2x8x32xf32>
    %34 = vector.extract_strided_slice %33 {offsets = [0, 0, 0], sizes = [2, 8, 16], strides = [1, 1, 1]} : vector<2x8x32xf32> to vector<2x8x16xf32>
    %35 = arith.mulf %34, %34 : vector<2x8x16xf32>
    %cst_18 = arith.constant dense<0.000000e+00> : vector<2x8xf32>
    %36 = vector.multi_reduction <add>, %35, %cst_18 [2] : vector<2x8x16xf32> to vector<2x8xf32>
    %37 = vector.shape_cast %36 : vector<2x8xf32> to vector<2x8x1xf32>
    %cst_19 = arith.constant 9.99999996E-13 : f32
    %38 = vector.broadcast %cst_19 : f32 to vector<2x8x1xf32>
    %39 = arith.addf %37, %38 : vector<2x8x1xf32>
    %40 = math.rsqrt %39 : vector<2x8x1xf32>
    %41 = vector.broadcast %40 : vector<2x8x1xf32> to vector<2x8x16xf32>
    %42 = arith.mulf %34, %41 : vector<2x8x16xf32>
    %43 = vector.extract_strided_slice %33 {offsets = [0, 0, 16], sizes = [2, 8, 16], strides = [1, 1, 1]} : vector<2x8x32xf32> to vector<2x8x16xf32>
    %44 = arith.mulf %43, %43 : vector<2x8x16xf32>
    %cst_20 = arith.constant dense<0.000000e+00> : vector<2x8xf32>
    %45 = vector.multi_reduction <add>, %44, %cst_20 [2] : vector<2x8x16xf32> to vector<2x8xf32>
    %46 = vector.shape_cast %45 : vector<2x8xf32> to vector<2x8x1xf32>
    %cst_21 = arith.constant 9.99999996E-13 : f32
    %47 = vector.broadcast %cst_21 : f32 to vector<2x8x1xf32>
    %48 = arith.addf %46, %47 : vector<2x8x1xf32>
    %49 = math.rsqrt %48 : vector<2x8x1xf32>
    %50 = vector.broadcast %49 : vector<2x8x1xf32> to vector<2x8x16xf32>
    %51 = arith.mulf %43, %50 : vector<2x8x16xf32>
    %52 = tpu.concatenate %42, %51 in 2 : vector<2x8x16xf32>, vector<2x8x16xf32> -> vector<2x8x32xf32>
    "tpu.trace_start"() <{level = 10 : i32, message = "bij,bjc->bic"}> : () -> ()
    %cst_22 = arith.constant dense<0.000000e+00> : vector<2x8x32xf32>
    %53 = tpu.matmul %1, %52, %cst_22 {dimension_numbers = #tpu.dot_dimension_numbers<[2], [1], [1], [2], [0, 0, 0, 1, 1, 2], [0], [0]>} : vector<2x8x8xf32>, vector<2x8x32xf32>, vector<2x8x32xf32> -> vector<2x8x32xf32>
    "tpu.trace_stop"() : () -> ()
    %cst_23 = arith.constant 3.000000e-01 : f32
    %54 = vector.broadcast %cst_23 : f32 to vector<2x8x32xf32>
    %55 = arith.mulf %54, %53 : vector<2x8x32xf32>
    %56 = arith.addf %52, %55 : vector<2x8x32xf32>
    %57 = vector.extract_strided_slice %56 {offsets = [0, 0, 0], sizes = [2, 8, 16], strides = [1, 1, 1]} : vector<2x8x32xf32> to vector<2x8x16xf32>
    %58 = arith.mulf %57, %57 : vector<2x8x16xf32>
    %cst_24 = arith.constant dense<0.000000e+00> : vector<2x8xf32>
    %59 = vector.multi_reduction <add>, %58, %cst_24 [2] : vector<2x8x16xf32> to vector<2x8xf32>
    %60 = vector.shape_cast %59 : vector<2x8xf32> to vector<2x8x1xf32>
    %cst_25 = arith.constant 9.99999996E-13 : f32
    %61 = vector.broadcast %cst_25 : f32 to vector<2x8x1xf32>
    %62 = arith.addf %60, %61 : vector<2x8x1xf32>
    %63 = math.rsqrt %62 : vector<2x8x1xf32>
    %64 = vector.broadcast %63 : vector<2x8x1xf32> to vector<2x8x16xf32>
    %65 = arith.mulf %57, %64 : vector<2x8x16xf32>
    %66 = vector.extract_strided_slice %56 {offsets = [0, 0, 16], sizes = [2, 8, 16], strides = [1, 1, 1]} : vector<2x8x32xf32> to vector<2x8x16xf32>
    %67 = arith.mulf %66, %66 : vector<2x8x16xf32>
    %cst_26 = arith.constant dense<0.000000e+00> : vector<2x8xf32>
    %68 = vector.multi_reduction <add>, %67, %cst_26 [2] : vector<2x8x16xf32> to vector<2x8xf32>
    %69 = vector.shape_cast %68 : vector<2x8xf32> to vector<2x8x1xf32>
    %cst_27 = arith.constant 9.99999996E-13 : f32
    %70 = vector.broadcast %cst_27 : f32 to vector<2x8x1xf32>
    %71 = arith.addf %69, %70 : vector<2x8x1xf32>
    %72 = math.rsqrt %71 : vector<2x8x1xf32>
    %73 = vector.broadcast %72 : vector<2x8x1xf32> to vector<2x8x16xf32>
    %74 = arith.mulf %66, %73 : vector<2x8x16xf32>
    %75 = tpu.concatenate %65, %74 in 2 : vector<2x8x16xf32>, vector<2x8x16xf32> -> vector<2x8x32xf32>
    "tpu.trace_start"() <{level = 10 : i32, message = "bij,bjc->bic"}> : () -> ()
    %cst_28 = arith.constant dense<0.000000e+00> : vector<2x8x32xf32>
    %76 = tpu.matmul %1, %75, %cst_28 {dimension_numbers = #tpu.dot_dimension_numbers<[2], [1], [1], [2], [0, 0, 0, 1, 1, 2], [0], [0]>} : vector<2x8x8xf32>, vector<2x8x32xf32>, vector<2x8x32xf32> -> vector<2x8x32xf32>
    "tpu.trace_stop"() : () -> ()
    %cst_29 = arith.constant 3.000000e-01 : f32
    %77 = vector.broadcast %cst_29 : f32 to vector<2x8x32xf32>
    %78 = arith.mulf %77, %76 : vector<2x8x32xf32>
    %79 = arith.addf %75, %78 : vector<2x8x32xf32>
    %80 = vector.extract_strided_slice %79 {offsets = [0, 0, 0], sizes = [2, 8, 16], strides = [1, 1, 1]} : vector<2x8x32xf32> to vector<2x8x16xf32>
    %81 = arith.mulf %80, %80 : vector<2x8x16xf32>
    %cst_30 = arith.constant dense<0.000000e+00> : vector<2x8xf32>
    %82 = vector.multi_reduction <add>, %81, %cst_30 [2] : vector<2x8x16xf32> to vector<2x8xf32>
    %83 = vector.shape_cast %82 : vector<2x8xf32> to vector<2x8x1xf32>
    %cst_31 = arith.constant 9.99999996E-13 : f32
    %84 = vector.broadcast %cst_31 : f32 to vector<2x8x1xf32>
    %85 = arith.addf %83, %84 : vector<2x8x1xf32>
    %86 = math.rsqrt %85 : vector<2x8x1xf32>
    %87 = vector.broadcast %86 : vector<2x8x1xf32> to vector<2x8x16xf32>
    %88 = arith.mulf %80, %87 : vector<2x8x16xf32>
    %89 = vector.extract_strided_slice %79 {offsets = [0, 0, 16], sizes = [2, 8, 16], strides = [1, 1, 1]} : vector<2x8x32xf32> to vector<2x8x16xf32>
    %90 = arith.mulf %89, %89 : vector<2x8x16xf32>
    %cst_32 = arith.constant dense<0.000000e+00> : vector<2x8xf32>
    %91 = vector.multi_reduction <add>, %90, %cst_32 [2] : vector<2x8x16xf32> to vector<2x8xf32>
    %92 = vector.shape_cast %91 : vector<2x8xf32> to vector<2x8x1xf32>
    %cst_33 = arith.constant 9.99999996E-13 : f32
    %93 = vector.broadcast %cst_33 : f32 to vector<2x8x1xf32>
    %94 = arith.addf %92, %93 : vector<2x8x1xf32>
    %95 = math.rsqrt %94 : vector<2x8x1xf32>
    %96 = vector.broadcast %95 : vector<2x8x1xf32> to vector<2x8x16xf32>
    %97 = arith.mulf %89, %96 : vector<2x8x16xf32>
    %98 = tpu.concatenate %88, %97 in 2 : vector<2x8x16xf32>, vector<2x8x16xf32> -> vector<2x8x32xf32>
    %c0_34 = arith.constant 0 : index
    %c0_35 = arith.constant 0 : index
    %c0_36 = arith.constant 0 : index
    %99 = vector.load %arg5[%c0_34, %c0_35, %c0_36] : memref<2x8x32xf32, #tpu.memory_space<vmem>>, vector<2x8x32xf32>
    tpu.vector_store %arg5[%c0_34, %c0_35, %c0_36], %98 {strides = array<i32>} : memref<2x8x32xf32, #tpu.memory_space<vmem>>, vector<2x8x32xf32>,
    return
  }
  func.func @transform_0(%arg0: i32) -> (i32, i32, i32) {
    %c0_i32 = arith.constant 0 : i32
    %c0_i32_0 = arith.constant 0 : i32
    %c0_i32_1 = arith.constant 0 : i32
    return %arg0, %c0_i32, %c0_i32_0 : i32, i32, i32
  }
  func.func @transform_1(%arg0: i32) -> (i32, i32, i32) {
    %c0_i32 = arith.constant 0 : i32
    %c0_i32_0 = arith.constant 0 : i32
    %c0_i32_1 = arith.constant 0 : i32
    return %arg0, %c0_i32, %c0_i32_0 : i32, i32, i32
  }
  func.func @transform_2(%arg0: i32) -> (i32, i32) {
    %c0_i32 = arith.constant 0 : i32
    %c0_i32_0 = arith.constant 0 : i32
    %c0_i32_1 = arith.constant 0 : i32
    return %c0_i32, %c0_i32_0 : i32, i32
  }
  func.func @transform_3(%arg0: i32) -> (i32, i32) {
    %c0_i32 = arith.constant 0 : i32
    %c0_i32_0 = arith.constant 0 : i32
    %c0_i32_1 = arith.constant 0 : i32
    return %c0_i32, %c0_i32_0 : i32, i32
  }
  func.func @transform_4(%arg0: i32) -> (i32, i32, i32) {
    %c0_i32 = arith.constant 0 : i32
    %c0_i32_0 = arith.constant 0 : i32
    %c0_i32_1 = arith.constant 0 : i32
    return %arg0, %c0_i32, %c0_i32_0 : i32, i32, i32
  }
  func.func @transform_5(%arg0: i32) -> (i32, i32, i32) {
    %c0_i32 = arith.constant 0 : i32
    %c0_i32_0 = arith.constant 0 : i32
    %c0_i32_1 = arith.constant 0 : i32
    return %arg0, %c0_i32, %c0_i32_0 : i32, i32, i32
  }
}

</mosaic_0001>

<bundles_post_ra>
// kernel: session_graph_forward.1
= control target key start
LH: loop header
LB: loop body
LE: loop exit
PB: predicated region body
PF: predicated region fallthrough
CT: control target
= control target key end

     0   :  { %11 = vsyncpa [#allocation3], 0  ;;  %s787_s0 = inlined_call_operand.vmem [shape: f32[2,8,32], index: 0, kind: input, shape index: {}]   ;;  %s788_s1 = inlined_call_operand.vmem [shape: f32[2,8,8], index: 1, kind: input, shape index: {}]   ;;  %s789_s2 = inlined_call_operand.vmem [shape: f32[32,32], index: 2, kind: input, shape index: {}]   ;;  %s790_s3 = inlined_call_operand.vmem [shape: f32[1,32], index: 3, kind: input, shape index: {}]   ;;  %s791_s4 = inlined_call_operand.hbm [shape: f32[2,8,32], index: 4, kind: output, shape index: {0}]   ;;  %s792_s5 = inlined_call_operand.hbm [shape: f32[2,8,32], index: 5, kind: output, shape index: {1}]  }
   0x1   :  { %v28_v0 = vld [vmem:[%s789_s2 + $0x18] sm:$0xff]  ;;  %v27_v1 = vld [vmem:[%s789_s2 + $0x10] sm:$0xff]  ;;  %v26_v2 = vld [vmem:[%s789_s2 + $0x8] sm:$0xff] }
   0x2   :  { %52 = vmatpush.msra.mxu0 %v28_v0 }
   0x3   :  { %12 = vsyncpa [#allocation5], 0  ;;  %v25_v3 = vld [vmem:[%s789_s2] sm:$0xff]  ;;  %vm33_vm0 = vcmask 261120   ;;  %v22_v5 = vld [vmem:[%s787_s0 + $0x8] sm:$0xff]  ;;  %vm67_vm1 = vcmask 130048  }
   0x4   :  { %53 = vmatpush.msra.mxu0 %v27_v1  ;;  %v21_v4 = vld [vmem:[%s787_s0] sm:$0xff]  ;;  %s635_s2 = smov 112   ;;  %vm140_vm9 = vcmask 64512   ;;  %v717_v63 = vld [vmem:[%s788_s1 + $0x8] sm:$0xff]  ;;  %s516_s12 = sshll.u32 %s792_s5, 4  ;;  %s517_s12 = int_to_ptr.hbm [resolvable:$true] %s516_s12 }
   0x5   :  { %v546_v6 = vld [vmem:[%s790_s3] ss:$0 sm:$0xff]  ;;  %s637_s13 = smov 128   ;;  %s638_s14 = smov 8  }
   0x6   :  { %54 = vmatpush.msra.mxu0 %v26_v2  ;;  %v706_v55 = vld [vmem:[%s788_s1] sm:$0xff]  ;;  %s636_s1 = smov [#allocation4]   ;;  %s639_s5 = smov [#allocation2]  }
   0x7   :  { %s514_s9 = sshll.u32 %s636_s1, 4  ;;  %s501_s15 = sshll.u32 %s639_s5, 4  ;;  %s515_s9 = int_to_ptr.vmem [resolvable:$true] %s514_s9  ;;  %s502_s15 = int_to_ptr.vmem [resolvable:$true] %s501_s15 }
   0x8   :  { %55 = vmatpush.msra.mxu0 %v25_v3  ;;  %s503_s18 = sshll.u32 %s791_s4, 4  ;;  %s504_s18 = int_to_ptr.hbm [resolvable:$true] %s503_s18 }
   0x9   :  { %533 = vmatmul.msk.f32.vlgmr.msra.gmra.mxu0 %vm33_vm0, %v21_v4 }
  0x11   :  { %534 = vmatmul.msk.f32.gmra.mxu0 %vm33_vm0, %v22_v5 }
  0x86   :  { %v57_v7 = vpop.f32.mrf.mxu0 }
  0x87   :  { %v58_v8 = vadd.f32 %v546_v6, %v57_v7 }
  0x89   :  { %547 = vtanh.f32 %v58_v8 }
  0x8e   :  { %v60_v9 = vpop.f32.mrf.mxu0 }
  0x8f   :  { %v548_v10 = vpop.eup %547  ;;  %v61_v11 = vadd.f32 %v546_v6, %v60_v9 }
  0x90   :  { %v65_v12 = vmul.f32 %v548_v10, %v548_v10 }
  0x91   :  { %549 = vtanh.f32 %v61_v11 }
  0x92   :  { %100 = vrot.lane.b32.xlu0 %v65_v12, %s635_s2  ;;  %v68_v13 = vsel %vm67_vm1, %v65_v12, 0.0 }
  0x93   :  { %69 = vadd.xlane.f32.xlu1 %v68_v13 }
  0x97   :  { %v695_v14 = vpop.eup %549 }
  0x98   :  { %v66_v15 = vmul.f32 %v695_v14, %v695_v14 }
  0x9a   :  { %102 = vrot.lane.b32.xlu0 %v66_v15, %s635_s2  ;;  %v71_v16 = vsel %vm67_vm1, %v66_v15, 0.0 }
  0x9b   :  { %72 = vadd.xlane.f32.xlu1 %v71_v16 }
 0x104   :  { %v101_v17 = vpop.permute.xlu0 %100 }
 0x105   :  { %v106_v18 = vsel %vm67_vm1, %v101_v17, 0.0 }
 0x106   :  { %107 = vadd.xlane.f32.xlu2 %v106_v18  ;;  %v70_v21 = vpop.xlane.xlu1 %69 }
 0x107   :  { %v74_v22 = vadd.f32 1e-12, %v70_v21 }
 0x109   :  { %551 = vrsqrt.f32 %v74_v22  ;;  %vm82_vm3 = vweird.f32 %v74_v22 }
 0x10c   :  { %v103_v19 = vpop.permute.xlu0 %102 }
 0x10d   :  { %v109_v20 = vsel %vm67_vm1, %v103_v19, 0.0 }
 0x10e   :  { %110 = vadd.xlane.f32.xlu2 %v109_v20  ;;  %v73_v23 = vpop.xlane.xlu1 %72 }
 0x10f   :  { %v75_v24 = vadd.f32 1e-12, %v73_v23  ;;  %v552_v25 = vpop.eup %551 }
 0x110   :  { %v77_v26 = vmul.f32 %v552_v25, %v74_v22  ;;  %vm83_vm2 = vweird.f32 %v552_v25 }
 0x111   :  { %553 = vrsqrt.f32 %v75_v24  ;;  %vm84_vm4 = vmor %vm82_vm3, %vm83_vm2  ;;  %vm92_vm10 = vweird.f32 %v75_v24 }
 0x112   :  { %v78_v28 = vmul.f32 %v552_v25, %v77_v26 }
 0x114   :  { %v79_v31 = vmul.f32 0.5, %v78_v28 }
 0x116   :  { %v80_v35 = vsub.f32 1.5, %v79_v31 }
 0x117   :  { %v554_v30 = vpop.eup %553 }
 0x118   :  { %v87_v32 = vmul.f32 %v554_v30, %v75_v24  ;;  %v81_v40 = vmul.f32 %v552_v25, %v80_v35  ;;  %vm93_vm8 = vweird.f32 %v554_v30 }
 0x119   :  { %vm94_vm12 = vmor %vm92_vm10, %vm93_vm8 }
 0x11a   :  { %v88_v37 = vmul.f32 %v554_v30, %v87_v32  ;;  %v85_v45 = vsel %vm84_vm4, %v552_v25, %v81_v40 }
 0x11b   :  { %v96_v51 = vmul.f32 %v548_v10, %v85_v45 }
 0x11c   :  { %v89_v41 = vmul.f32 0.5, %v88_v37 }
 0x11e   :  { %v90_v46 = vsub.f32 1.5, %v89_v41 }
 0x120   :  { %v91_v53 = vmul.f32 %v554_v30, %v90_v46 }
 0x122   :  { %v95_v59 = vsel %vm94_vm12, %v554_v30, %v91_v53 }
 0x123   :  { %v97_v61 = vmul.f32 %v695_v14, %v95_v59 }
 0x179   :  { %v108_v27 = vpop.xlane.xlu2 %107 }
 0x17a   :  { %v112_v29 = vadd.f32 1e-12, %v108_v27 }
 0x17c   :  { %555 = vrsqrt.f32 %v112_v29  ;;  %vm120_vm6 = vweird.f32 %v112_v29 }
 0x181   :  { %v111_v33 = vpop.xlane.xlu2 %110 }
 0x182   :  { %v556_v34 = vpop.eup %555  ;;  %v113_v36 = vadd.f32 1e-12, %v111_v33 }
 0x183   :  { %v115_v38 = vmul.f32 %v556_v34, %v112_v29  ;;  %vm121_vm5 = vweird.f32 %v556_v34 }
 0x184   :  { %557 = vrsqrt.f32 %v113_v36  ;;  %vm122_vm7 = vmor %vm120_vm6, %vm121_vm5  ;;  %vm130_vm13 = vweird.f32 %v113_v36 }
 0x185   :  { %v116_v39 = vmul.f32 %v556_v34, %v115_v38 }
 0x187   :  { %v117_v42 = vmul.f32 0.5, %v116_v39 }
 0x189   :  { %v118_v43 = vsub.f32 1.5, %v117_v42 }
 0x18a   :  { %v558_v44 = vpop.eup %557 }
 0x18b   :  { %v119_v47 = vmul.f32 %v556_v34, %v118_v43  ;;  %v125_v48 = vmul.f32 %v558_v44, %v113_v36  ;;  %vm131_vm11 = vweird.f32 %v558_v44 }
 0x18c   :  { %vm132_vm14 = vmor %vm130_vm13, %vm131_vm11 }
 0x18d   :  { %v126_v49 = vmul.f32 %v558_v44, %v125_v48  ;;  %v123_v50 = vsel %vm122_vm7, %v556_v34, %v119_v47 }
 0x18e   :  { %v134_v52 = vmul.f32 %v548_v10, %v123_v50 }
 0x18f   :  { %v127_v54 = vmul.f32 0.5, %v126_v49 }
 0x190   :  { %v136_v56 = vsel %vm67_vm1, %v96_v51, %v134_v52 }
 0x191   :  { %v128_v57 = vsub.f32 1.5, %v127_v54  ;;  %138 = vst.msk [vmem:[#allocation4] sm:$0xff] %vm33_vm0, %v136_v56  ;;  %159 = vmatpush.msra.mxu1 %v136_v56 }
 0x192   :  { %535 = vmatmul.msk.f32.vlgmr.msra.gmra.mxu1 %vm140_vm9, %v706_v55 }
 0x193   :  { %v129_v58 = vmul.f32 %v558_v44, %v128_v57 }
 0x195   :  { %v133_v60 = vsel %vm132_vm14, %v558_v44, %v129_v58 }
 0x196   :  { %v135_v62 = vmul.f32 %v695_v14, %v133_v60 }
 0x198   :  { %v137_v0 = vsel %vm67_vm1, %v97_v61, %v135_v62 }
 0x199   :  { %139 = vst.msk [vmem:[#allocation4 + $0x8] sm:$0xff] %vm33_vm0, %v137_v0  ;;  %182 = vmatpush.msra.mxu2 %v137_v0 }
 0x19a   :  { %536 = vmatmul.msk.f32.vlgmr.msra.gmra.mxu2 %vm140_vm9, %v717_v63  ;;  %522 = dma.vmem_to_hbm [thread:$0]  %s515_s9, 256, %s517_s12, [#allocation5], %s637_s13, %s637_s13, %s638_s14  }
 0x20f   :  { %v161_v1 = vpop.f32.mrf.mxu1 }
 0x210   :  { %v187_v2 = vmul.f32 0.3, %v161_v1 }
 0x212   :  { %v189_v3 = vadd.f32 %v187_v2, %v136_v56 }
 0x214   :  { %v191_v4 = vmul.f32 %v189_v3, %v189_v3 }
 0x216   :  { %225 = vrot.lane.b32.xlu0 %v191_v4, %s635_s2  ;;  %v193_v5 = vsel %vm67_vm1, %v191_v4, 0.0 }
 0x217   :  { %194 = vadd.xlane.f32.xlu2 %v193_v5 }
 0x21d   :  { %v184_v6 = vpop.f32.mrf.mxu2 }
 0x21e   :  { %v188_v7 = vmul.f32 0.3, %v184_v6 }
 0x220   :  { %v725_v8 = vadd.f32 %v188_v7, %v137_v0 }
 0x222   :  { %v192_v9 = vmul.f32 %v725_v8, %v725_v8 }
 0x224   :  { %227 = vrot.lane.b32.xlu1 %v192_v9, %s635_s2  ;;  %v196_v10 = vsel %vm67_vm1, %v192_v9, 0.0 }
 0x225   :  { %197 = vadd.xlane.f32.xlu2 %v196_v10 }
 0x288   :  { %v226_v11 = vpop.permute.xlu0 %225 }
 0x289   :  { %v231_v12 = vsel %vm67_vm1, %v226_v11, 0.0 }
 0x28a   :  { %232 = vadd.xlane.f32.xlu0 %v231_v12  ;;  %v195_v15 = vpop.xlane.xlu2 %194 }
 0x28b   :  { %v199_v16 = vadd.f32 1e-12, %v195_v15 }
 0x28d   :  { %559 = vrsqrt.f32 %v199_v16  ;;  %vm207_vm2 = vweird.f32 %v199_v16 }
 0x293   :  { %v560_v17 = vpop.eup %559 }
 0x294   :  { %v202_v19 = vmul.f32 %v560_v17, %v199_v16  ;;  %vm208_vm15 = vweird.f32 %v560_v17 }
 0x295   :  { %vm209_vm4 = vmor %vm207_vm2, %vm208_vm15 }
 0x296   :  { %v228_v13 = vpop.permute.xlu1 %227  ;;  %v203_v23 = vmul.f32 %v560_v17, %v202_v19 }
 0x297   :  { %v234_v14 = vsel %vm67_vm1, %v228_v13, 0.0 }
 0x298   :  { %235 = vadd.xlane.f32.xlu2 %v234_v14  ;;  %v198_v18 = vpop.xlane.xlu2 %197  ;;  %v204_v24 = vmul.f32 0.5, %v203_v23 }
 0x299   :  { %v200_v20 = vadd.f32 1e-12, %v198_v18 }
 0x29a   :  { %v205_v27 = vsub.f32 1.5, %v204_v24 }
 0x29b   :  { %561 = vrsqrt.f32 %v200_v20  ;;  %vm217_vm8 = vweird.f32 %v200_v20 }
 0x29c   :  { %v206_v31 = vmul.f32 %v560_v17, %v205_v27 }
 0x29e   :  { %v210_v38 = vsel %vm209_vm4, %v560_v17, %v206_v31 }
 0x29f   :  { %v221_v41 = vmul.f32 %v210_v38, %v189_v3 }
 0x2a1   :  { %v562_v25 = vpop.eup %561 }
 0x2a2   :  { %v212_v29 = vmul.f32 %v562_v25, %v200_v20  ;;  %vm218_vm7 = vweird.f32 %v562_v25 }
 0x2a3   :  { %vm219_vm11 = vmor %vm217_vm8, %vm218_vm7 }
 0x2a4   :  { %v213_v35 = vmul.f32 %v562_v25, %v212_v29 }
 0x2a6   :  { %v214_v39 = vmul.f32 0.5, %v213_v35 }
 0x2a8   :  { %v215_v45 = vsub.f32 1.5, %v214_v39 }
 0x2aa   :  { %v216_v48 = vmul.f32 %v562_v25, %v215_v45 }
 0x2ac   :  { %v220_v52 = vsel %vm219_vm11, %v562_v25, %v216_v48 }
 0x2ad   :  { %v222_v54 = vmul.f32 %v220_v52, %v725_v8 }
 0x2fd   :  { %v233_v21 = vpop.xlane.xlu0 %232 }
 0x2fe   :  { %v237_v22 = vadd.f32 1e-12, %v233_v21 }
 0x300   :  { %563 = vrsqrt.f32 %v237_v22  ;;  %vm245_vm5 = vweird.f32 %v237_v22 }
 0x306   :  { %v564_v26 = vpop.eup %563 }
 0x307   :  { %v240_v28 = vmul.f32 %v564_v26, %v237_v22  ;;  %vm246_vm3 = vweird.f32 %v564_v26 }
 0x308   :  { %vm247_vm6 = vmor %vm245_vm5, %vm246_vm3 }
 0x309   :  { %v241_v30 = vmul.f32 %v564_v26, %v240_v28 }
 0x30b   :  { %v242_v32 = vmul.f32 0.5, %v241_v30  ;;  %v236_v33 = vpop.xlane.xlu2 %235 }
 0x30c   :  { %v238_v34 = vadd.f32 1e-12, %v236_v33 }
 0x30d   :  { %v243_v36 = vsub.f32 1.5, %v242_v32 }
 0x30e   :  { %565 = vrsqrt.f32 %v238_v34  ;;  %vm255_vm12 = vweird.f32 %v238_v34 }
 0x30f   :  { %v244_v37 = vmul.f32 %v564_v26, %v243_v36 }
 0x311   :  { %v248_v40 = vsel %vm247_vm6, %v564_v26, %v244_v37 }
 0x312   :  { %v259_v42 = vmul.f32 %v248_v40, %v189_v3 }
 0x314   :  { %v566_v43 = vpop.eup %565  ;;  %v261_v44 = vsel %vm67_vm1, %v221_v41, %v259_v42 }
 0x315   :  { %v250_v46 = vmul.f32 %v566_v43, %v238_v34  ;;  %278 = vmatpush.msra.mxu3 %v261_v44  ;;  %vm256_vm10 = vweird.f32 %v566_v43 }
 0x316   :  { %537 = vmatmul.msk.f32.vlgmr.msra.gmra.mxu3 %vm140_vm9, %v706_v55  ;;  %vm257_vm13 = vmor %vm255_vm12, %vm256_vm10 }
 0x317   :  { %v251_v47 = vmul.f32 %v566_v43, %v250_v46 }
 0x319   :  { %v252_v49 = vmul.f32 0.5, %v251_v47 }
 0x31b   :  { %v253_v50 = vsub.f32 1.5, %v252_v49 }
 0x31d   :  { %v254_v51 = vmul.f32 %v566_v43, %v253_v50 }
 0x31f   :  { %v258_v53 = vsel %vm257_vm13, %v566_v43, %v254_v51 }
 0x320   :  { %v260_v56 = vmul.f32 %v258_v53, %v725_v8 }
 0x322   :  { %v262_v57 = vsel %vm67_vm1, %v222_v54, %v260_v56 }
 0x323   :  { %298 = vmatpush.msrb.mxu1 %v262_v57 }
 0x324   :  { %538 = vmatmul.msk.f32.vlgmr.msrb.gmra.mxu1 %vm140_vm9, %v717_v63 }
 0x399   :  { %v280_v58 = vpop.f32.mrf.mxu3 }
 0x39a   :  { %v303_v59 = vmul.f32 0.3, %v280_v58 }
 0x39c   :  { %v305_v60 = vadd.f32 %v303_v59, %v261_v44 }
 0x39e   :  { %v307_v61 = vmul.f32 %v305_v60, %v305_v60 }
 0x3a0   :  { %341 = vrot.lane.b32.xlu2 %v307_v61, %s635_s2  ;;  %v309_v4 = vsel %vm67_vm1, %v307_v61, 0.0 }
 0x3a1   :  { %v300_v62 = vpop.f32.mrf.mxu1 }
 0x3a2   :  { %v304_v0 = vmul.f32 0.3, %v300_v62 }
 0x3a4   :  { %v742_v1 = vadd.f32 %v304_v0, %v262_v57 }
 0x3a6   :  { %v308_v2 = vmul.f32 %v742_v1, %v742_v1 }
 0x3a8   :  { %343 = vrot.lane.b32.xlu1 %v308_v2, %s635_s2  ;;  %v312_v3 = vsel %vm67_vm1, %v308_v2, 0.0 }
 0x3c9   :  { %313 = vadd.xlane.f32.xlu2 %v312_v3 }
 0x3d2   :  { %310 = vadd.xlane.f32.xlu1 %v309_v4 }
 0x3fa   :  { %v342_v5 = vpop.permute.xlu2 %341 }
 0x3fb   :  { %v347_v6 = vsel %vm67_vm1, %v342_v5, 0.0 }
 0x3fc   :  { %348 = vadd.xlane.f32.xlu0 %v347_v6 }
 0x41a   :  { %v344_v7 = vpop.permute.xlu1 %343 }
 0x41b   :  { %v350_v8 = vsel %vm67_vm1, %v344_v7, 0.0 }
 0x41c   :  { %351 = vadd.xlane.f32.xlu0 %v350_v8 }
 0x43c   :  { %v314_v21 = vpop.xlane.xlu2 %313 }
 0x43d   :  { %v316_v25 = vadd.f32 1e-12, %v314_v21 }
 0x43f   :  { %vm333_vm7 = vweird.f32 %v316_v25 }
 0x445   :  { %v311_v9 = vpop.xlane.xlu1 %310 }
 0x446   :  { %v315_v10 = vadd.f32 1e-12, %v311_v9 }
 0x448   :  { %567 = vrsqrt.f32 %v315_v10  ;;  %vm323_vm15 = vweird.f32 %v315_v10 }
 0x44e   :  { %v568_v11 = vpop.eup %567 }
 0x44f   :  { %v318_v12 = vmul.f32 %v568_v11, %v315_v10  ;;  %vm324_vm14 = vweird.f32 %v568_v11 }
 0x450   :  { %vm325_vm3 = vmor %vm323_vm15, %vm324_vm14 }
 0x451   :  { %v319_v15 = vmul.f32 %v568_v11, %v318_v12 }
 0x453   :  { %v320_v16 = vmul.f32 0.5, %v319_v15 }
 0x455   :  { %v321_v18 = vsub.f32 1.5, %v320_v16 }
 0x457   :  { %v322_v22 = vmul.f32 %v568_v11, %v321_v18 }
 0x459   :  { %v326_v27 = vsel %vm325_vm3, %v568_v11, %v322_v22 }
 0x45a   :  { %v337_v29 = vmul.f32 %v326_v27, %v305_v60 }
 0x46f   :  { %v349_v13 = vpop.xlane.xlu0 %348 }
 0x470   :  { %v353_v14 = vadd.f32 1e-12, %v349_v13 }
 0x472   :  { %569 = vrsqrt.f32 %v353_v14  ;;  %vm361_vm4 = vweird.f32 %v353_v14 }
 0x473   :  { %571 = vrsqrt.f32 %v316_v25 }
 0x478   :  { %v570_v17 = vpop.eup %569 }
 0x479   :  { %v356_v19 = vmul.f32 %v570_v17, %v353_v14  ;;  %vm362_vm2 = vweird.f32 %v570_v17  ;;  %v572_v32 = vpop.eup %571 }
 0x47a   :  { %vm363_vm5 = vmor %vm361_vm4, %vm362_vm2  ;;  %v328_v33 = vmul.f32 %v572_v32, %v316_v25  ;;  %vm334_vm6 = vweird.f32 %v572_v32 }
 0x47b   :  { %v357_v20 = vmul.f32 %v570_v17, %v356_v19  ;;  %vm335_vm10 = vmor %vm333_vm7, %vm334_vm6 }
 0x47c   :  { %v329_v36 = vmul.f32 %v572_v32, %v328_v33 }
 0x47d   :  { %v358_v23 = vmul.f32 0.5, %v357_v20 }
 0x47e   :  { %v330_v37 = vmul.f32 0.5, %v329_v36 }
 0x47f   :  { %v359_v24 = vsub.f32 1.5, %v358_v23 }
 0x480   :  { %v331_v39 = vsub.f32 1.5, %v330_v37 }
 0x481   :  { %v360_v26 = vmul.f32 %v570_v17, %v359_v24 }
 0x482   :  { %v332_v42 = vmul.f32 %v572_v32, %v331_v39 }
 0x483   :  { %v364_v28 = vsel %vm363_vm5, %v570_v17, %v360_v26 }
 0x484   :  { %v375_v30 = vmul.f32 %v364_v28, %v305_v60 }
 0x486   :  { %v377_v31 = vsel %vm67_vm1, %v337_v29, %v375_v30 }
 0x487   :  { %394 = vmatpush.msrb.mxu2 %v377_v31 }
 0x488   :  { %539 = vmatmul.msk.f32.vlgmr.msrb.gmra.mxu2 %vm140_vm9, %v706_v55  ;;  %v336_v55 = vsel %vm335_vm10, %v572_v32, %v332_v42 }
 0x489   :  { %v338_v47 = vmul.f32 %v336_v55, %v742_v1 }
 0x48f   :  { %v352_v34 = vpop.xlane.xlu0 %351 }
 0x490   :  { %v354_v35 = vadd.f32 1e-12, %v352_v34 }
 0x492   :  { %573 = vrsqrt.f32 %v354_v35  ;;  %vm371_vm11 = vweird.f32 %v354_v35 }
 0x498   :  { %v574_v38 = vpop.eup %573 }
 0x499   :  { %v366_v40 = vmul.f32 %v574_v38, %v354_v35  ;;  %vm372_vm8 = vweird.f32 %v574_v38 }
 0x49a   :  { %vm373_vm12 = vmor %vm371_vm11, %vm372_vm8 }
 0x49b   :  { %v367_v41 = vmul.f32 %v574_v38, %v366_v40 }
 0x49d   :  { %v368_v43 = vmul.f32 0.5, %v367_v41 }
 0x49f   :  { %v369_v44 = vsub.f32 1.5, %v368_v43 }
 0x4a1   :  { %v370_v45 = vmul.f32 %v574_v38, %v369_v44 }
 0x4a3   :  { %v374_v46 = vsel %vm373_vm12, %v574_v38, %v370_v45 }
 0x4a4   :  { %v376_v48 = vmul.f32 %v374_v46, %v742_v1 }
 0x4a6   :  { %v378_v49 = vsel %vm67_vm1, %v338_v47, %v376_v48 }
 0x4a7   :  { %414 = vmatpush.msrb.mxu3 %v378_v49 }
 0x4a8   :  { %540 = vmatmul.msk.f32.vlgmr.msrb.gmra.mxu3 %vm140_vm9, %v717_v63 }
 0x50b   :  { %v396_v50 = vpop.f32.mrf.mxu2 }
 0x50c   :  { %v419_v51 = vmul.f32 0.3, %v396_v50 }
 0x50e   :  { %v421_v52 = vadd.f32 %v419_v51, %v377_v31 }
 0x510   :  { %v423_v53 = vmul.f32 %v421_v52, %v421_v52 }
 0x512   :  { %457 = vrot.lane.b32.xlu0 %v423_v53, %s635_s2  ;;  %v425_v63 = vsel %vm67_vm1, %v423_v53, 0.0 }
 0x52b   :  { %v416_v54 = vpop.f32.mrf.mxu3 }
 0x52c   :  { %v420_v56 = vmul.f32 0.3, %v416_v54 }
 0x52e   :  { %v760_v57 = vadd.f32 %v420_v56, %v378_v49 }
 0x530   :  { %v424_v58 = vmul.f32 %v760_v57, %v760_v57 }
 0x532   :  { %459 = vrot.lane.b32.xlu1 %v424_v58, %s635_s2  ;;  %v428_v59 = vsel %vm67_vm1, %v424_v58, 0.0 }
 0x533   :  { %429 = vadd.xlane.f32.xlu2 %v428_v59 }
 0x53c   :  { %426 = vadd.xlane.f32.xlu0 %v425_v63 }
 0x584   :  { %v458_v60 = vpop.permute.xlu0 %457 }
 0x585   :  { %v463_v61 = vsel %vm67_vm1, %v458_v60, 0.0 }
 0x586   :  { %464 = vadd.xlane.f32.xlu2 %v463_v61 }
 0x5a4   :  { %v460_v62 = vpop.permute.xlu1 %459 }
 0x5a5   :  { %v466_v0 = vsel %vm67_vm1, %v460_v62, 0.0 }
 0x5a6   :  { %467 = vadd.xlane.f32.xlu1 %v466_v0  ;;  %v430_v3 = vpop.xlane.xlu2 %429 }
 0x5a7   :  { %v432_v17 = vadd.f32 1e-12, %v430_v3 }
 0x5a9   :  { %vm449_vm5 = vweird.f32 %v432_v17 }
 0x5af   :  { %v427_v1 = vpop.xlane.xlu0 %426 }
 0x5b0   :  { %v431_v2 = vadd.f32 1e-12, %v427_v1 }
 0x5b2   :  { %575 = vrsqrt.f32 %v431_v2  ;;  %vm439_vm13 = vweird.f32 %v431_v2 }
 0x5b8   :  { %v576_v4 = vpop.eup %575 }
 0x5b9   :  { %v434_v5 = vmul.f32 %v576_v4, %v431_v2  ;;  %vm440_vm9 = vweird.f32 %v576_v4 }
 0x5ba   :  { %vm441_vm15 = vmor %vm439_vm13, %vm440_vm9 }
 0x5bb   :  { %v435_v8 = vmul.f32 %v576_v4, %v434_v5 }
 0x5bd   :  { %v436_v9 = vmul.f32 0.5, %v435_v8 }
 0x5bf   :  { %v437_v11 = vsub.f32 1.5, %v436_v9 }
 0x5c1   :  { %v438_v14 = vmul.f32 %v576_v4, %v437_v11 }
 0x5c3   :  { %v442_v18 = vsel %vm441_vm15, %v576_v4, %v438_v14 }
 0x5c4   :  { %v453_v21 = vmul.f32 %v442_v18, %v421_v52 }
 0x5f9   :  { %v465_v6 = vpop.xlane.xlu2 %464 }
 0x5fa   :  { %v469_v7 = vadd.f32 1e-12, %v465_v6 }
 0x5fc   :  { %577 = vrsqrt.f32 %v469_v7  ;;  %vm477_vm2 = vweird.f32 %v469_v7 }
 0x5fd   :  { %579 = vrsqrt.f32 %v432_v17 }
 0x602   :  { %v578_v10 = vpop.eup %577 }
 0x603   :  { %v472_v12 = vmul.f32 %v578_v10, %v469_v7  ;;  %vm478_vm14 = vweird.f32 %v578_v10  ;;  %v580_v24 = vpop.eup %579 }
 0x604   :  { %vm479_vm3 = vmor %vm477_vm2, %vm478_vm14  ;;  %v444_v25 = vmul.f32 %v580_v24, %v432_v17  ;;  %vm450_vm4 = vweird.f32 %v580_v24 }
 0x605   :  { %v473_v13 = vmul.f32 %v578_v10, %v472_v12  ;;  %vm451_vm7 = vmor %vm449_vm5, %vm450_vm4 }
 0x606   :  { %v445_v28 = vmul.f32 %v580_v24, %v444_v25 }
 0x607   :  { %v474_v15 = vmul.f32 0.5, %v473_v13 }
 0x608   :  { %v446_v29 = vmul.f32 0.5, %v445_v28 }
 0x609   :  { %v475_v16 = vsub.f32 1.5, %v474_v15 }
 0x60a   :  { %v447_v31 = vsub.f32 1.5, %v446_v29 }
 0x60b   :  { %v476_v19 = vmul.f32 %v578_v10, %v475_v16 }
 0x60c   :  { %v448_v34 = vmul.f32 %v580_v24, %v447_v31 }
 0x60d   :  { %v480_v20 = vsel %vm479_vm3, %v578_v10, %v476_v19 }
 0x60e   :  { %v491_v22 = vmul.f32 %v480_v20, %v421_v52  ;;  %v452_v37 = vsel %vm451_vm7, %v580_v24, %v448_v34 }
 0x60f   :  { %v454_v40 = vmul.f32 %v452_v37, %v760_v57 }
 0x610   :  { %v493_v23 = vsel %vm67_vm1, %v453_v21, %v491_v22 }
 0x611   :  { %495 = vst.msk [vmem:[#allocation2] sm:$0xff] %vm33_vm0, %v493_v23 }
 0x619   :  { %v468_v26 = vpop.xlane.xlu1 %467 }
 0x61a   :  { %v470_v27 = vadd.f32 1e-12, %v468_v26 }
 0x61c   :  { %581 = vrsqrt.f32 %v470_v27  ;;  %vm487_vm8 = vweird.f32 %v470_v27 }
 0x622   :  { %v582_v30 = vpop.eup %581 }
 0x623   :  { %v482_v32 = vmul.f32 %v582_v30, %v470_v27  ;;  %vm488_vm6 = vweird.f32 %v582_v30 }
 0x624   :  { %vm489_vm10 = vmor %vm487_vm8, %vm488_vm6 }
 0x625   :  { %v483_v33 = vmul.f32 %v582_v30, %v482_v32 }
 0x627   :  { %v484_v35 = vmul.f32 0.5, %v483_v33 }
 0x629   :  { %v485_v36 = vsub.f32 1.5, %v484_v35 }
 0x62b   :  { %v486_v38 = vmul.f32 %v582_v30, %v485_v36 }
 0x62d   :  { %v490_v39 = vsel %vm489_vm10, %v582_v30, %v486_v38 }
 0x62e   :  { %v492_v41 = vmul.f32 %v490_v39, %v760_v57 }
 0x630   :  { %v494_v42 = vsel %vm67_vm1, %v454_v40, %v492_v41 }
 0x631   :  { %496 = vst.msk [vmem:[#allocation2 + $0x8] sm:$0xff] %vm33_vm0, %v494_v42 }
 0x632   :  { %509 = dma.vmem_to_hbm [thread:$0]  %s502_s15, 256, %s504_s18, [#allocation3], %s637_s13, %s637_s13, %s638_s14  }
 0x633   :  { %631 = dma.done.wait [#allocation3], 256  }
 0x634   :  { %632 = vsyncadd [#allocation3], 4294967040 }
 0x635   :  { %633 = dma.done.wait [#allocation5], 256  }
 0x636   :  { %634 = vsyncadd [#allocation5], 4294967040 }
 0x637   :  { %531 = vsyncpa [#allocation3], 1 }
 0x638   :  { %532 = vsyncpa [#allocation5], 1 }

</bundles_post_ra>
